<compile_context>
chip_gen: v6e
topology: v6e:2x2x1
jax: 0.10.0
libtpu: 0.0.40
codegen_flags: <defaults>
</compile_context>

<pallas_src>
import functools
import math

import jax
import jax.numpy as jnp
from jax.experimental import pallas as pl
from jax.experimental.pallas import tpu as pltpu


# ---------------------------------------------------------------------------
# Shared sincos: Cody-Waite range reduction + cephes minimax polynomials.
# ---------------------------------------------------------------------------
_TWO_OVER_PI = 2.0 / math.pi


def _chop(v: float, bits: int) -> float:
    """Truncate v's mantissa to `bits` significant bits (exact f32 products)."""
    m, e = math.frexp(v)
    return math.ldexp(math.floor(m * (1 << bits)) / (1 << bits), e)


# 3-constant split of pi/2: PIO2_1/PIO2_2 have <=12 significant bits, so
# k*PIO2_1 and k*PIO2_2 are exact in f32 for |k| <= 2**12 (|mapped| up to a few
# thousand, far beyond what sigma=32 produces); PIO2_3 mops up the residual.
_PIO2_1 = _chop(math.pi / 2, 12)
_PIO2_2 = _chop(math.pi / 2 - _PIO2_1, 12)
_PIO2_3 = math.pi / 2 - _PIO2_1 - _PIO2_2

# cephes sinf/cosf minimax polynomials, valid on |r| <= pi/4 (error ~1e-7).
_SP1, _SP2, _SP3 = -1.6666654611e-1, 8.3321608736e-3, -1.9515295891e-4
_CP1, _CP2, _CP3 = 4.166664568298827e-2, -1.388731625493765e-3, 2.443315711809948e-5


def _sincos_lanes(m, num_freqs):
    """Fused sin/cos with one shared range reduction per lane.

    `m` is the packed pre-activation: inside every group of 2F lanes, lanes
    [0, F) and [F, 2F) carry the SAME mapped value.  The first half must
    return sin, the second half cos.  Since cos(x) = sin(x + pi/2), cosine
    lanes simply use quadrant k+1 -- the range reduction and both short
    polynomials are evaluated once per lane (no second transcendental pass).
    """
    f32 = jnp.float32
    two_f = 2 * num_freqs

    lane = jax.lax.broadcasted_iota(jnp.int32, m.shape, m.ndim - 1)
    if (two_f & (two_f - 1)) == 0:              # power-of-two fast path (default)
        is_cos = (lane & num_freqs) != 0
    else:
        is_cos = (lane % two_f) >= num_freqs
    qoff = is_cos.astype(jnp.int32)             # 0 = sin lane, 1 = cos lane

    # k = round(m * 2/pi); floor(z + 0.5) is enough (any nearest-ish integer
    # keeps |r| <~ pi/4, where the polynomials are valid).
    kf = jnp.floor(m * f32(_TWO_OVER_PI) + f32(0.5))
    r = ((m - kf * f32(_PIO2_1)) - kf * f32(_PIO2_2)) - kf * f32(_PIO2_3)
    q = (kf.astype(jnp.int32) + qoff) & 3       # effective quadrant per lane

    r2 = r * r
    sin_p = r + r * r2 * (f32(_SP1) + r2 * (f32(_SP2) + r2 * f32(_SP3)))
    cos_p = (f32(1.0) - f32(0.5) * r2) + r2 * r2 * (
        f32(_CP1) + r2 * (f32(_CP2) + r2 * f32(_CP3)))

    poly = jnp.where((q & 1) == 0, sin_p, cos_p)
    return jnp.where((q & 2) == 0, poly, -poly)


# ---------------------------------------------------------------------------
# Kernel body: one lane-dense tile per grid step.
# ---------------------------------------------------------------------------
def _fourier_kernel(xp_ref, bblk_ref, o_ref, *, num_freqs):
    """xp_ref:   (TNP, P*D)   f32  packed rows (P original rows per packed row)
       bblk_ref: (P*D, P*2F)  f32  block-diagonal scaled basis, blocks = [B^T|B^T]
       o_ref:    (TNP, P*2F)  f32  packed [sin|cos] output (minor dim % 128 == 0)
    """
    m = jnp.dot(xp_ref[...], bblk_ref[...], preferred_element_type=jnp.float32)
    o_ref[...] = _sincos_lanes(m, num_freqs)


# ---------------------------------------------------------------------------
# Wrapper
# ---------------------------------------------------------------------------
@functools.partial(jax.jit, static_argnames=("tile_rows",))
def learned_fourier_encode(x, basis, extra_scale, *, tile_rows=32768):
    """x: (..., input_dims) f32; basis: (num_freqs, input_dims) f32;
       extra_scale: scalar f32.  Returns (..., 2*num_freqs) f32."""
    orig_shape = x.shape
    d = orig_shape[-1]
    f = basis.shape[0]
    two_f = 2 * f

    x2 = x.reshape(-1, d).astype(jnp.float32)
    n = x2.shape[0]

    # Row-packing factor: smallest P with P*2F a multiple of 128 lanes.
    pack = math.lcm(two_f, 128) // two_f        # = 4 for the default F=16
    granule = 8 * pack                          # sublane(8) * packing rows

    def _round_up(a, b):
        return (a + b - 1) // b * b

    # Static tile selection: as big as tile_rows to amortize the ~0.35us
    # per-step overhead, but aim for >=4 grid steps when the input allows it
    # so each of v7x's two TensorCores gets >=2 steps (keeps double-buffering
    # alive on both cores).
    quarter = _round_up(pl.cdiv(n, 4), granule)
    eff_tile = min(tile_rows, quarter)
    eff_tile = max(granule, (eff_tile // granule) * granule)

    n_pad = _round_up(n, eff_tile)
    if n_pad != n:                              # glue only for ragged tails
        x2 = jnp.pad(x2, ((0, n_pad - n), (0, 0)))

    # Fold extra_scale into the basis, duplicate it for the [sin | cos] halves
    # and build the block-diagonal packed operand.  All tiny trace-level ops.
    bT = (jnp.asarray(extra_scale, jnp.float32) * basis.astype(jnp.float32)).T  # (D, F)
    bT2 = jnp.concatenate([bT, bT], axis=1)                                     # (D, 2F)
    bblk = jnp.kron(jnp.eye(pack, dtype=jnp.float32), bT2)                      # (P*D, P*2F)

    # Contiguous (free) repack of the input rows: (n_pad, D) -> (n_pad/P, P*D).
    xp = x2.reshape(n_pad // pack, pack * d)
    out_cols = pack * two_f
    tile_p = eff_tile // pack
    grid = (n_pad // eff_tile,)

    cost = pl.CostEstimate(
        flops=2 * n_pad * d * f,
        transcendentals=2 * n_pad * f,
        bytes_accessed=4 * n_pad * (d + two_f),
    )

    out_packed = pl.pallas_call(
        functools.partial(_fourier_kernel, num_freqs=f),
        out_shape=jax.ShapeDtypeStruct((n_pad // pack, out_cols), jnp.float32),
        grid_spec=pltpu.PrefetchScalarGridSpec(
            num_scalar_prefetch=0,
            grid=grid,
            in_specs=[
                pl.BlockSpec((tile_p, pack * d), lambda i: (i, 0)),   # packed x rows
                pl.BlockSpec((pack * d, out_cols), lambda i: (0, 0)), # block-diag basis
            ],
            out_specs=pl.BlockSpec((tile_p, out_cols), lambda i: (i, 0)),
        ),
        compiler_params=pltpu.CompilerParams(
            dimension_semantics=("parallel",),
            vmem_limit_bytes=48 * 1024 * 1024,   # fits every gen (v7x: 64 MiB phys)
        ),
        cost_estimate=cost,
    )(xp, bblk)

    # Free (contiguous) un-pack back to the PyTorch layout, then drop padding.
    out = out_packed.reshape(n_pad, two_f)[:n]
    return out.reshape(*orig_shape[:-1], two_f)


def make_params(key, input_dims=3, num_freqs=16, sigma=1 << 5):
    """Deterministic stand-in for create_fourier_basis + extra_scale init."""
    basis = sigma * jax.random.normal(key, (num_freqs, input_dims), jnp.float32)
    extra_scale = jnp.float32(1.0)
    return basis, extra_scale


if __name__ == "__main__":
    key = jax.random.PRNGKey(0)
    k_basis, k_x = jax.random.split(key)

    input_dims, num_freqs, sigma = 3, 16, 1 << 5
    basis, extra_scale = make_params(k_basis, input_dims, num_freqs, sigma)

    # Small coordinate batch: (batch=2, seq=256, input_dims=3) -> 512 rows.
    x = jax.random.uniform(k_x, (2, 256, input_dims), jnp.float32)

    out = learned_fourier_encode(x, basis, extra_scale)
    out = jax.block_until_ready(out)

    # Reference (pure JAX) check of the forward semantics.
    mapped_ref = x @ (extra_scale * basis).T
    ref = jnp.concatenate([jnp.sin(mapped_ref), jnp.cos(mapped_ref)], axis=-1)

    assert out.shape == (2, 256, 2 * num_freqs), out.shape
    # |mapped| reaches O(100) (sigma = 32), so a few-ulp difference between the
    # kernel's MXU dot and XLA's reference dot appears as ~1e-4 absolute in
    # sin/cos; the tolerance reflects that matmul ulp noise, not the sincos
    # accuracy (the shared sincos itself is accurate to ~1e-6).
    assert jnp.allclose(out, ref, atol=5e-4, rtol=1e-4), "mismatch vs reference"

    print("KERNEL_OK")
</pallas_src>

<mosaic_0001>
module attributes {stable_mosaic.version = 11 : i64} {
  func.func @_fourier_kernel(%arg0: i32, %arg1: memref<32x12xf32, #tpu.memory_space<vmem>>, %arg2: memref<12x128xf32, #tpu.memory_space<vmem>>, %arg3: memref<32x128xf32, #tpu.memory_space<vmem>>) attributes {dimension_semantics = [#tpu.dimension_semantics<parallel>], iteration_bounds = array<i64: 4>, scalar_prefetch = 0 : i64, scratch_operands = 0 : i64, tpu.core_type = #tpu.core_type<tc>, window_params = [{transform_indices = @transform_0, window_bounds = array<i64: 32, 12>}, {pipeline_mode = #tpu.pipeline_mode<synchronous>, transform_indices = @transform_1, window_bounds = array<i64: 12, 128>}, {transform_indices = @transform_2, window_bounds = array<i64: 32, 128>}]} {
    %c0 = arith.constant 0 : index
    %c0_0 = arith.constant 0 : index
    %0 = vector.load %arg1[%c0, %c0_0] : memref<32x12xf32, #tpu.memory_space<vmem>>, vector<32x12xf32>
    %c0_1 = arith.constant 0 : index
    %c0_2 = arith.constant 0 : index
    %1 = vector.load %arg2[%c0_1, %c0_2] : memref<12x128xf32, #tpu.memory_space<vmem>>, vector<12x128xf32>
    %cst = arith.constant dense<0.000000e+00> : vector<32x128xf32>
    %2 = tpu.matmul %0, %1, %cst {dimension_numbers = #tpu.dot_dimension_numbers<[1], [0], [0], [1], [0, 0, 1, 1], [], []>} : vector<32x12xf32>, vector<12x128xf32>, vector<32x128xf32> -> vector<32x128xf32>
    %3 = tpu.iota {dimensions = array<i32: 1>} : vector<32x128xi32>
    %c16_i32 = arith.constant 16 : i32
    %4 = vector.broadcast %c16_i32 : i32 to vector<32x128xi32>
    %5 = arith.andi %3, %4 : vector<32x128xi32>
    %c0_i32 = arith.constant 0 : i32
    %6 = vector.broadcast %c0_i32 : i32 to vector<32x128xi32>
    %7 = arith.cmpi ne, %5, %6 : vector<32x128xi32>
    %8 = arith.extui %7 : vector<32x128xi1> to vector<32x128xi32>
    %cst_3 = arith.constant 0.636619746 : f32
    %9 = vector.broadcast %cst_3 : f32 to vector<32x128xf32>
    %10 = arith.mulf %2, %9 : vector<32x128xf32>
    %cst_4 = arith.constant 5.000000e-01 : f32
    %11 = vector.broadcast %cst_4 : f32 to vector<32x128xf32>
    %12 = arith.addf %10, %11 : vector<32x128xf32>
    %13 = math.floor %12 : vector<32x128xf32>
    %cst_5 = arith.constant 1.5703125 : f32
    %14 = vector.broadcast %cst_5 : f32 to vector<32x128xf32>
    %15 = arith.mulf %13, %14 : vector<32x128xf32>
    %16 = arith.subf %2, %15 : vector<32x128xf32>
    %cst_6 = arith.constant 4.83751297E-4 : f32
    %17 = vector.broadcast %cst_6 : f32 to vector<32x128xf32>
    %18 = arith.mulf %13, %17 : vector<32x128xf32>
    %19 = arith.subf %16, %18 : vector<32x128xf32>
    %cst_7 = arith.constant 7.549790e-08 : f32
    %20 = vector.broadcast %cst_7 : f32 to vector<32x128xf32>
    %21 = arith.mulf %13, %20 : vector<32x128xf32>
    %22 = arith.subf %19, %21 : vector<32x128xf32>
    %23 = arith.fptosi %13 : vector<32x128xf32> to vector<32x128xi32>
    %24 = arith.addi %23, %8 : vector<32x128xi32>
    %c3_i32 = arith.constant 3 : i32
    %25 = vector.broadcast %c3_i32 : i32 to vector<32x128xi32>
    %26 = arith.andi %24, %25 : vector<32x128xi32>
    %27 = arith.mulf %22, %22 : vector<32x128xf32>
    %28 = arith.mulf %22, %27 : vector<32x128xf32>
    %cst_8 = arith.constant -1.95152956E-4 : f32
    %29 = vector.broadcast %cst_8 : f32 to vector<32x128xf32>
    %30 = arith.mulf %27, %29 : vector<32x128xf32>
    %cst_9 = arith.constant 0.00833216123 : f32
    %31 = vector.broadcast %cst_9 : f32 to vector<32x128xf32>
    %32 = arith.addf %31, %30 : vector<32x128xf32>
    %33 = arith.mulf %27, %32 : vector<32x128xf32>
    %cst_10 = arith.constant -0.166666552 : f32
    %34 = vector.broadcast %cst_10 : f32 to vector<32x128xf32>
    %35 = arith.addf %34, %33 : vector<32x128xf32>
    %36 = arith.mulf %28, %35 : vector<32x128xf32>
    %37 = arith.addf %22, %36 : vector<32x128xf32>
    %cst_11 = arith.constant 5.000000e-01 : f32
    %38 = vector.broadcast %cst_11 : f32 to vector<32x128xf32>
    %39 = arith.mulf %38, %27 : vector<32x128xf32>
    %cst_12 = arith.constant 1.000000e+00 : f32
    %40 = vector.broadcast %cst_12 : f32 to vector<32x128xf32>
    %41 = arith.subf %40, %39 : vector<32x128xf32>
    %42 = arith.mulf %27, %27 : vector<32x128xf32>
    %cst_13 = arith.constant 2.44331568E-5 : f32
    %43 = vector.broadcast %cst_13 : f32 to vector<32x128xf32>
    %44 = arith.mulf %27, %43 : vector<32x128xf32>
    %cst_14 = arith.constant -0.00138873165 : f32
    %45 = vector.broadcast %cst_14 : f32 to vector<32x128xf32>
    %46 = arith.addf %45, %44 : vector<32x128xf32>
    %47 = arith.mulf %27, %46 : vector<32x128xf32>
    %cst_15 = arith.constant 0.0416666456 : f32
    %48 = vector.broadcast %cst_15 : f32 to vector<32x128xf32>
    %49 = arith.addf %48, %47 : vector<32x128xf32>
    %50 = arith.mulf %42, %49 : vector<32x128xf32>
    %51 = arith.addf %41, %50 : vector<32x128xf32>
    %c1_i32 = arith.constant 1 : i32
    %52 = vector.broadcast %c1_i32 : i32 to vector<32x128xi32>
    %53 = arith.andi %26, %52 : vector<32x128xi32>
    %c0_i32_16 = arith.constant 0 : i32
    %54 = vector.broadcast %c0_i32_16 : i32 to vector<32x128xi32>
    %55 = arith.cmpi eq, %53, %54 : vector<32x128xi32>
    %56 = arith.select %55, %37, %51 : vector<32x128xi1>, vector<32x128xf32>
    %c2_i32 = arith.constant 2 : i32
    %57 = vector.broadcast %c2_i32 : i32 to vector<32x128xi32>
    %58 = arith.andi %26, %57 : vector<32x128xi32>
    %c0_i32_17 = arith.constant 0 : i32
    %59 = vector.broadcast %c0_i32_17 : i32 to vector<32x128xi32>
    %60 = arith.cmpi eq, %58, %59 : vector<32x128xi32>
    %cst_18 = arith.constant 0.000000e+00 : f32
    %61 = vector.broadcast %cst_18 : f32 to vector<32x128xf32>
    %62 = arith.subf %61, %56 : vector<32x128xf32>
    %63 = arith.select %60, %56, %62 : vector<32x128xi1>, vector<32x128xf32>
    %c0_19 = arith.constant 0 : index
    %c0_20 = arith.constant 0 : index
    %64 = vector.load %arg3[%c0_19, %c0_20] : memref<32x128xf32, #tpu.memory_space<vmem>>, vector<32x128xf32>
    tpu.vector_store %arg3[%c0_19, %c0_20], %63 {strides = array<i32>} : memref<32x128xf32, #tpu.memory_space<vmem>>, vector<32x128xf32>,
    return
  }
  func.func @transform_0(%arg0: i32) -> (i32, i32) {
    %c0_i32 = arith.constant 0 : i32
    %c0_i32_0 = arith.constant 0 : i32
    return %arg0, %c0_i32 : i32, i32
  }
  func.func @transform_1(%arg0: i32) -> (i32, i32) {
    %c0_i32 = arith.constant 0 : i32
    %c0_i32_0 = arith.constant 0 : i32
    %c0_i32_1 = arith.constant 0 : i32
    return %c0_i32, %c0_i32_0 : i32, i32
  }
  func.func @transform_2(%arg0: i32) -> (i32, i32) {
    %c0_i32 = arith.constant 0 : i32
    %c0_i32_0 = arith.constant 0 : i32
    return %arg0, %c0_i32 : i32, i32
  }
}

</mosaic_0001>

<bundles_post_ra>
// kernel: learned_fourier_encode.1
= control target key start
LH: loop header
LB: loop body
LE: loop exit
PB: predicated region body
PF: predicated region fallthrough
CT: control target
= control target key end

     0   :  { %s541_s9 = smov 0   ;;  %s601_s0 = inlined_call_operand.vmem [shape: f32[128,12], index: 0, kind: input, shape index: {}]   ;;  %s602_s1 = inlined_call_operand.vmem [shape: f32[12,128], index: 1, kind: input, shape index: {}]   ;;  %s603_s2 = inlined_call_operand.vmem [shape: f32[128,128], index: 2, kind: output, shape index: {}]  }
   0x1 LB: > { %s464_s10 = sadd.s32 4294967295, %s523_s9   ;;  %p468_p0 = scmp.ge.s32.totalorder %s523_s9, 1  ;;  %s523_s9 = sphi %s541_s9, %s12_s9  }
   0x2   : > { %p113_p1 = scmp.lt.s32.totalorder %s523_s9, 5 }
   0x4   : > { %p114_p2 = pnand %p468_p0, %p113_p1 }
   0x5   : > { %s469_s15 = sshll.u32 (!%p114_p2), %s464_s10, 2 }
   0x6   : > { %117 = sbr.rel (%p114_p2) target bundleno = 260 (0x104), region = 28  ;;  %p136_p3 = scmp.lt.s32.totalorder (!%p114_p2), %s469_s15, 15 }
   0xb   : > { %v152_v0 = vld [vmem:[%s602_s1 + $0x8] sm:$0xf]  ;;  %vm166_vm0 = vcmask 1043456   ;;  %v151_v1 = vld [vmem:[%s602_s1] sm:$0xff]  ;;  %s605_s15 = smov (!%p136_p3, %s469_s15), 15  ;;  %vm153_vm1 = vcmask 97280   ;;  %v255_v6 = vlaneseq }
   0xc   : > { %486 = vmatprep.subr.msk.mxu0 %vm166_vm0, %v152_v0  ;;  %496 = vmatprep.subr.msk.mxu1 %vm166_vm0, %v152_v0  ;;  %s470_s16 = sshll.u32 %s605_s15, 3  ;;  %v525_v24 = vmov 0  }
   0xd   : > { %487 = vmatpush3.msk.msra.mxu0 %vm166_vm0, %v152_v0  ;;  %498 = vmatpush3.msk.msra.mxu1 %vm166_vm0, %v152_v0  ;;  %s139_s19 = scalar_lea.vmem %s601_s0, %s470_s16  ;;  %v256_v7 = vand.u32 127, %v255_v6  ;;  %s588_s22 = scalar_lea.vmem %s603_s2, %s470_s16 }
   0xe   : > { %488 = vmatprep.subr.mxu0 %v151_v1  ;;  %497 = vmatprep.subr.mxu1 %v151_v1  ;;  %v147_v2 = vld [vmem:[%s139_s19] sm:$0xff]  ;;  %v149_v3 = vld [vmem:[%s139_s19 + $0x10] sm:$0xff]  ;;  %v148_v4 = vld [vmem:[%s139_s19 + $0x8] sm:$0xff] }
   0xf   : > { %489 = vmatpush3.msra.mxu0 %v151_v1  ;;  %499 = vmatpush3.msra.mxu1 %v151_v1  ;;  %v150_v5 = vld [vmem:[%s139_s19 + $0x18] sm:$0xff]  ;;  %v257_v10 = vand.u32 16, %v256_v7 }
  0x10   : > { %490 = vmatprep.mubr.msk.f32.mxu0 %vm153_vm1, %v147_v2  ;;  %493 = vmatprep.mubr.msk.f32.mxu1 %vm153_vm1, %v149_v3 }
  0x11   : > { %491 = vmatmul.mubr.msk.f32.vlgmr.msra.gmra.mxu0 %vm153_vm1, %v148_v4  ;;  %494 = vmatmul.mubr.msk.f32.vlgmr.msra.gmra.mxu1 %vm153_vm1, %v150_v5  ;;  %vm258_vm2 = vcmp.ne.s32.totalorder %v257_v10, 0 }
  0x12   : > { %v566_v25 = vsel %vm258_vm2, 1, %v525_v24 }
  0xd1   : > { %v492_v8 = vpop.f32.mrf.mxu0  ;;  %v495_v9 = vpop.f32.mrf.mxu1 }
  0xd2   : > { %v261_v11 = vmul.f32 0.63661975, %v492_v8  ;;  %v263_v12 = vmul.f32 0.63661975, %v495_v9 }
  0xd3   : > { %v236_v13 = vpop.f32.mrf.mxu0  ;;  %v563_v14 = vpop.f32.mrf.mxu1 }
  0xd4   : > { %v265_v15 = vadd.f32 0.5, %v261_v11  ;;  %v267_v16 = vadd.f32 0.5, %v263_v12  ;;  %v260_v17 = vmul.f32 0.63661975, %v236_v13  ;;  %v262_v18 = vmul.f32 0.63661975, %v563_v14 }
  0xd6   : > { %v269_v19 = vfloor.f32 %v265_v15  ;;  %v271_v20 = vfloor.f32 %v267_v16  ;;  %v264_v21 = vadd.f32 0.5, %v260_v17  ;;  %v266_v28 = vadd.f32 0.5, %v262_v18 }
  0xd8   : > { %v273_v22 = vmul.f32 1.5703125, %v269_v19  ;;  %v502_v23 = vtrunc.f32 %v269_v19  ;;  %v275_v26 = vmul.f32 1.5703125, %v271_v20  ;;  %v506_v27 = vtrunc.f32 %v271_v20 }
  0xd9   : > { %v281_v30 = vmul.f32 0.0004837513, %v269_v19  ;;  %v268_v32 = vfloor.f32 %v264_v21  ;;  %v283_v34 = vmul.f32 0.0004837513, %v271_v20  ;;  %v289_v37 = vmul.f32 7.54979e-08, %v269_v19 }
  0xda   : > { %v277_v29 = vsub.f32 %v492_v8, %v273_v22  ;;  %v503_v31 = vcvt.f32.s32 %v502_v23  ;;  %v279_v33 = vsub.f32 %v495_v9, %v275_v26  ;;  %v507_v35 = vcvt.f32.s32 %v506_v27 }
  0xdb   : > { %v272_v39 = vmul.f32 1.5703125, %v268_v32  ;;  %v291_v41 = vmul.f32 7.54979e-08, %v271_v20  ;;  %v500_v43 = vtrunc.f32 %v268_v32  ;;  %v570_v45 = vfloor.f32 %v266_v28 }
  0xdc   : > { %v285_v36 = vsub.f32 %v277_v29, %v281_v30  ;;  %v301_v38 = vadd.s32 %v503_v31, %v566_v25  ;;  %v287_v40 = vsub.f32 %v279_v33, %v283_v34  ;;  %v303_v42 = vadd.s32 %v507_v35, %v566_v25 }
  0xdd   : > { %v276_v48 = vsub.f32 %v236_v13, %v272_v39  ;;  %v280_v52 = vmul.f32 0.0004837513, %v268_v32  ;;  %v501_v53 = vcvt.f32.s32 %v500_v43  ;;  %v288_v55 = vmul.f32 7.54979e-08, %v268_v32 }
  0xde   : > { %v293_v44 = vsub.f32 %v285_v36, %v289_v37  ;;  %v305_v46 = vand.u32 3, %v301_v38  ;;  %v295_v47 = vsub.f32 %v287_v40, %v291_v41  ;;  %v307_v50 = vand.u32 3, %v303_v42 }
  0xdf   : > { %v274_v56 = vmul.f32 1.5703125, %v570_v45  ;;  %v282_v57 = vmul.f32 0.0004837513, %v570_v45  ;;  %v284_v61 = vsub.f32 %v276_v48, %v280_v52  ;;  %v577_v5 = vadd.s32 %v501_v53, %v566_v25 }
  0xe0   : > { %v309_v49 = vmul.f32 %v293_v44, %v293_v44  ;;  %v311_v51 = vmul.f32 %v295_v47, %v295_v47  ;;  %v377_v59 = vand.u32 1, %v305_v46  ;;  %v389_v60 = vand.u32 2, %v305_v46 }
  0xe1   : > { %v379_v0 = vand.u32 1, %v307_v50  ;;  %v574_v1 = vand.u32 2, %v307_v50  ;;  %v292_v12 = vsub.f32 %v284_v61, %v288_v55  ;;  %v278_v17 = vsub.f32 %v563_v14, %v274_v56 }
  0xe2   : > { %v317_v54 = vmul.f32 -0.00019515296, %v309_v49  ;;  %v353_v58 = vmul.f32 2.4433157e-05, %v309_v49  ;;  %v319_v63 = vmul.f32 -0.00019515296, %v311_v51  ;;  %v313_v2 = vmul.f32 %v309_v49, %v293_v44 }
  0xe3   : > { %v355_v4 = vmul.f32 2.4433157e-05, %v311_v51  ;;  %v341_v7 = vmul.f32 0.5, %v309_v49  ;;  %v349_v8 = vmul.f32 %v309_v49, %v309_v49  ;;  %vm381_vm3 = vcmp.eq.s32.totalorder %v377_v59, 0 }
  0xe4   : > { %v321_v62 = vadd.f32 0.008332161, %v317_v54  ;;  %v357_v3 = vadd.f32 -0.0013887316, %v353_v58  ;;  %v323_v9 = vadd.f32 0.008332161, %v319_v63  ;;  %v308_v20 = vmul.f32 %v292_v12, %v292_v12 }
  0xe5   : > { %v359_v11 = vadd.f32 -0.0013887316, %v355_v4  ;;  %v343_v16 = vmul.f32 0.5, %v311_v51  ;;  %vm393_vm4 = vcmp.eq.s32.totalorder %v389_v60, 0  ;;  %v345_v22 = vsub.f32 1.0, %v341_v7 }
  0xe6   : > { %v325_v6 = vmul.f32 %v321_v62, %v309_v49  ;;  %v361_v10 = vmul.f32 %v357_v3, %v309_v49  ;;  %v327_v15 = vmul.f32 %v323_v9, %v311_v51  ;;  %v315_v23 = vmul.f32 %v311_v51, %v295_v47 }
  0xe7   : > { %v363_v19 = vmul.f32 %v359_v11, %v311_v51  ;;  %v351_v27 = vmul.f32 %v311_v51, %v311_v51  ;;  %v316_v29 = vmul.f32 -0.00019515296, %v308_v20  ;;  %v347_v32 = vsub.f32 1.0, %v343_v16 }
  0xe8   : > { %v329_v13 = vadd.f32 -0.16666655, %v325_v6  ;;  %v365_v18 = vadd.f32 0.041666646, %v361_v10  ;;  %v331_v24 = vadd.f32 -0.16666655, %v327_v15  ;;  %v286_v33 = vsub.f32 %v278_v17, %v282_v57 }
  0xe9   : > { %v367_v28 = vadd.f32 0.041666646, %v363_v19  ;;  %v320_v14 = vadd.f32 0.008332161, %v316_v29  ;;  %v352_v36 = vmul.f32 2.4433157e-05, %v308_v20  ;;  %v312_v46 = vmul.f32 %v308_v20, %v292_v12 }
  0xea   : > { %v333_v21 = vmul.f32 %v329_v13, %v313_v2  ;;  %v369_v26 = vmul.f32 %v365_v18, %v349_v8  ;;  %v335_v31 = vmul.f32 %v331_v24, %v315_v23  ;;  %vm383_vm5 = vcmp.eq.s32.totalorder %v379_v0, 0 }
  0xeb   : > { %v371_v35 = vmul.f32 %v367_v28, %v351_v27  ;;  %v304_v38 = vand.u32 3, %v577_v5  ;;  %v290_v39 = vmul.f32 7.54979e-08, %v570_v45  ;;  %v324_v42 = vmul.f32 %v320_v14, %v308_v20 }
  0xec   : > { %v337_v30 = vadd.f32 %v333_v21, %v293_v44  ;;  %v373_v34 = vadd.f32 %v369_v26, %v345_v22  ;;  %v339_v37 = vadd.f32 %v335_v31, %v295_v47  ;;  %v356_v43 = vadd.f32 -0.0013887316, %v352_v36 }
  0xed   : > { %v375_v41 = vadd.f32 %v371_v35, %v347_v32  ;;  %v294_v47 = vsub.f32 %v286_v33, %v290_v39  ;;  %v504_v48 = vtrunc.f32 %v570_v45  ;;  %v328_v50 = vadd.f32 -0.16666655, %v324_v42 }
  0xee   : > { %v385_v40 = vsel %vm381_vm3, %v337_v30, %v373_v34  ;;  %v340_v51 = vmul.f32 0.5, %v308_v20  ;;  %v360_v52 = vmul.f32 %v356_v43, %v308_v20  ;;  %vm395_vm6 = vcmp.eq.s32.totalorder %v574_v1, 0 }
  0xef   : > { %v397_v44 = vsub.f32 0.0, %v385_v40  ;;  %v387_v49 = vsel %vm383_vm5, %v339_v37, %v375_v41  ;;  %v505_v55 = vcvt.f32.s32 %v504_v48  ;;  %v310_v56 = vmul.f32 %v294_v47, %v294_v47 }
  0xf0   : > { %v399_v54 = vsub.f32 0.0, %v387_v49  ;;  %v332_v57 = vmul.f32 %v328_v50, %v312_v46  ;;  %v348_v58 = vmul.f32 %v308_v20, %v308_v20  ;;  %v364_v59 = vadd.f32 0.041666646, %v360_v52 }
  0xf1   : > { %v401_v53 = vsel %vm393_vm4, %v385_v40, %v397_v44  ;;  %v376_v62 = vand.u32 1, %v304_v38  ;;  %v318_v63 = vmul.f32 -0.00019515296, %v310_v56  ;;  %v344_v0 = vsub.f32 1.0, %v340_v51 }
  0xf2   : > { %405 = vst [vmem:[%s588_s22 + $0x8] sm:$0xff] %v401_v53  ;;  %v403_v61 = vsel %vm395_vm6, %v387_v49, %v399_v54  ;;  %v336_v45 = vadd.f32 %v332_v57, %v292_v12  ;;  %v368_v2 = vmul.f32 %v364_v59, %v348_v58  ;;  %v302_v3 = vadd.s32 %v505_v55, %v566_v25 }
  0xf3   : > { %407 = vst [vmem:[%s588_s22 + $0x18] sm:$0xff] %v403_v61  ;;  %v322_v60 = vadd.f32 0.008332161, %v318_v63  ;;  %v354_v4 = vmul.f32 2.4433157e-05, %v310_v56  ;;  %v388_v6 = vand.u32 2, %v304_v38  ;;  %v314_v10 = vmul.f32 %v310_v56, %v294_v47 }
  0xf4   : > { %v372_v5 = vadd.f32 %v368_v2, %v344_v0  ;;  %vm380_vm7 = vcmp.eq.s32.totalorder %v376_v62, 0  ;;  %v306_v9 = vand.u32 3, %v302_v3  ;;  %v342_v15 = vmul.f32 0.5, %v310_v56 }
  0xf5   : > { %v326_v7 = vmul.f32 %v322_v60, %v310_v56  ;;  %v358_v1 = vadd.f32 -0.0013887316, %v354_v4  ;;  %vm392_vm8 = vcmp.eq.s32.totalorder %v388_v6, 0  ;;  %v350_v25 = vmul.f32 %v310_v56, %v310_v56 }
  0xf6   : > { %v384_v8 = vsel %vm380_vm7, %v336_v45, %v372_v5  ;;  %v378_v19 = vand.u32 1, %v306_v9  ;;  %v346_v21 = vsub.f32 1.0, %v342_v15  ;;  %v390_v24 = vand.u32 2, %v306_v9 }
  0xf7   : > { %v396_v11 = vsub.f32 0.0, %v384_v8  ;;  %v330_v13 = vadd.f32 -0.16666655, %v326_v7  ;;  %v362_v16 = vmul.f32 %v358_v1, %v310_v56 }
  0xf8   : > { %vm382_vm9 = vcmp.eq.s32.totalorder %v378_v19, 0  ;;  %vm394_vm10 = vcmp.eq.s32.totalorder %v390_v24, 0 }
  0xf9   : > { %v400_v12 = vsel %vm392_vm8, %v384_v8, %v396_v11  ;;  %v334_v17 = vmul.f32 %v330_v13, %v314_v10  ;;  %v366_v18 = vadd.f32 0.041666646, %v362_v16 }
  0xfa   : > { %404 = vst [vmem:[%s588_s22] sm:$0xff] %v400_v12 }
  0xfb   : > { %v338_v20 = vadd.f32 %v334_v17, %v294_v47  ;;  %v370_v22 = vmul.f32 %v366_v18, %v350_v25 }
  0xfd   : > { %v374_v23 = vadd.f32 %v370_v22, %v346_v21 }
  0xff   : > { %v386_v26 = vsel %vm382_vm9, %v338_v20, %v374_v23 }
 0x100   : > { %v398_v27 = vsub.f32 0.0, %v386_v26 }
 0x102   : > { %v402_v28 = vsel %vm394_vm10, %v386_v26, %v398_v27 }
 0x103   : > { %406 = vst [vmem:[%s588_s22 + $0x10] sm:$0xff] %v402_v28 }
 0x104 PF: > { %s12_s9 = sadd.s32 1, %s523_s9  }
 0x105   : > { %p9_p4 = scmp.ge.s32.totalorder %s12_s9, 6  }
 0x107   :  { %11 = sbr.rel (!%p9_p4) target bundleno = 1 (0x1), region = 58 }

</bundles_post_ra>
